<compile_context>
chip_gen: v7x
topology: tpu7x:2x2x1
jax: 0.10.0
libtpu: 0.0.40
codegen_flags: <defaults>
</compile_context>

<pallas_src>
import functools

import jax
import jax.numpy as jnp
from jax.experimental import pallas as pl
from jax.experimental.pallas import tpu as pltpu


def self_output_kernel(h_ref, x_ref, wt_ref, b_ref, g_ref, beta_ref, o_ref,
                       *, eps, compute_dtype):
    # Dense: y = h @ W^T + b.  wt_ref already holds W^T ([in, out]) in the
    # compute dtype (bf16 by default); cast the activation tile and accumulate
    # in f32 on the MXU.
    h = h_ref[...].astype(compute_dtype)
    y = jnp.dot(h, wt_ref[...], preferred_element_type=jnp.float32)
    y = y + b_ref[...].astype(jnp.float32)

    # Dropout: module is evaluated in inference mode -> identity.
    # TODO(synk): training-mode dropout (pltpu.prng_random_bits mask) not emitted.

    # Residual add + LayerNorm over last dim (f32 epilogue).
    z = y + x_ref[...].astype(jnp.float32)                    # [TM, H] f32
    hdim = z.shape[-1]
    inv_h = 1.0 / hdim
    # Single-pass statistics: one pair of XLU reductions, no centered temp
    # materialized before the reduce.
    s1 = jnp.sum(z, axis=-1, keepdims=True)
    s2 = jnp.sum(z * z, axis=-1, keepdims=True)
    mean = s1 * inv_h
    var = jnp.maximum(s2 * inv_h - mean * mean, 0.0)
    inv = jax.lax.rsqrt(var + eps)                             # EUP
    out = (z - mean) * inv * g_ref[...].astype(jnp.float32) \
        + beta_ref[...].astype(jnp.float32)
    o_ref[...] = out.astype(o_ref.dtype)


def prepare_params(params, compute_dtype=jnp.bfloat16):
    """One-time parameter prep: store W^T in the matmul compute dtype."""
    p = dict(params)
    if "dense_wt" not in p:
        p["dense_wt"] = jnp.asarray(p["dense_w"]).T
    p["dense_wt"] = p["dense_wt"].astype(compute_dtype)
    return p


def _vmem_estimate(tm, H, in_bytes, out_bytes, w_bytes):
    return (4 * tm * H * in_bytes       # h & x tiles, double-buffered
            + 2 * tm * H * out_bytes    # output tile, double-buffered
            + 2 * H * H * w_bytes       # W^T (worst case: double-buffered)
            + 3 * tm * H * 4)           # f32 temporaries in the epilogue


def _make_call(R, H, tm, out_dtype, eps, compute_dtype, vmem_limit,
               single_buffer_consts):
    # Single-buffer the grid-invariant operands when supported (they are never
    # re-fetched: constant index_map), which halves the weight's VMEM footprint.
    const_kw = {"pipeline_mode": pl.Buffered(1)} if single_buffer_consts else {}
    kernel = functools.partial(self_output_kernel, eps=eps,
                               compute_dtype=compute_dtype)
    return pl.pallas_call(
        kernel,
        out_shape=jax.ShapeDtypeStruct((R, H), out_dtype),
        grid_spec=pl.GridSpec(
            grid=(pl.cdiv(R, tm),),                      # ragged last block OK
            in_specs=[
                pl.BlockSpec((tm, H), lambda i: (i, 0)),             # h tile
                pl.BlockSpec((tm, H), lambda i: (i, 0)),             # residual
                pl.BlockSpec((H, H), lambda i: (0, 0), **const_kw),  # W^T
                pl.BlockSpec((1, H), lambda i: (0, 0), **const_kw),  # dense bias
                pl.BlockSpec((1, H), lambda i: (0, 0), **const_kw),  # LN gamma
                pl.BlockSpec((1, H), lambda i: (0, 0), **const_kw),  # LN beta
            ],
            out_specs=pl.BlockSpec((tm, H), lambda i: (i, 0)),
        ),
        compiler_params=pltpu.CompilerParams(
            # Shards row tiles across the 2 TensorCores on v7x (no-op on
            # v5e/v6e).  Note: each TC holds its own W^T copy; for very large
            # H consider VMEM_SHARED placement or streaming N-blocks.
            dimension_semantics=("parallel",),
            vmem_limit_bytes=vmem_limit,
        ),
    )


def bert_generation_self_output(hidden_states, input_tensor, params,
                                eps=1e-12, tm=None,
                                compute_dtype=jnp.bfloat16):
    """hidden_states, input_tensor: [B, S, H]. params: dict of weights."""
    B, S, H = hidden_states.shape
    R = B * S
    h2 = hidden_states.reshape(R, H)
    x2 = input_tensor.reshape(R, H)

    # Weight: prefer the pre-transposed, pre-cast copy from prepare_params();
    # fall back to a per-call transpose only if it was not prepared.
    wt = params.get("dense_wt")
    if wt is None:
        wt = params["dense_w"].T
    wt = wt.astype(compute_dtype)
    b = params["dense_b"].reshape(1, H)
    g = params["ln_w"].reshape(1, H)
    beta = params["ln_b"].reshape(1, H)

    in_bytes = jnp.dtype(hidden_states.dtype).itemsize
    w_bytes = jnp.dtype(compute_dtype).itemsize

    # Row-tile choice: bigger tiles amortize the ~0.35us per-grid-step overhead
    # (HBM-bound regime on v6e/v7x); keep tm a multiple of 128 to feed the MXU
    # (v5e is 4x128^2).  Small shapes just round up to the sublane multiple.
    auto_tm = tm is None
    if auto_tm:
        cap = 1024 if w_bytes <= 2 else 512
        r8 = ((R + 7) // 8) * 8
        tm = min(cap, max(8, r8))
        if tm >= 128:
            tm = (tm // 128) * 128
        # Shrink the auto tile if the working set would blow the v7x 64 MiB
        # VMEM ceiling (large-H configs).  TODO(synk): stream weight N-blocks
        # instead of shrinking tm for H >= 2048-4096.
        while tm > 8 and _vmem_estimate(tm, H, in_bytes, in_bytes, w_bytes) > (56 << 20):
            tm = max(8, tm // 2)

    est = _vmem_estimate(tm, H, in_bytes, in_bytes, w_bytes)
    vmem_limit = int(min(max(est * 12 // 10 + (4 << 20), 32 << 20), 64 << 20))

    args = (h2, x2, wt, b, g, beta)
    try:
        out2 = _make_call(R, H, tm, hidden_states.dtype, eps, compute_dtype,
                          vmem_limit, single_buffer_consts=True)(*args)
    except Exception:
        # pipeline_mode=pl.Buffered(1) not supported by this Pallas build:
        # fall back to default double-buffering of the constant operands.
        out2 = _make_call(R, H, tm, hidden_states.dtype, eps, compute_dtype,
                          vmem_limit, single_buffer_consts=False)(*args)

    return out2.reshape(B, S, H)


def _reference(hidden_states, input_tensor, params, eps=1e-12):
    y = hidden_states @ params["dense_w"].T + params["dense_b"]
    z = y + input_tensor
    mean = jnp.mean(z, axis=-1, keepdims=True)
    var = jnp.mean((z - mean) ** 2, axis=-1, keepdims=True)
    return (z - mean) / jnp.sqrt(var + eps) * params["ln_w"] + params["ln_b"]


if __name__ == "__main__":
    key = jax.random.PRNGKey(0)
    B, S, H = 2, 8, 32  # batch, seq, hidden
    k1, k2, k3, k4 = jax.random.split(key, 4)

    hidden_states = jax.random.normal(k1, (B, S, H), dtype=jnp.float32)
    input_tensor = jax.random.normal(k2, (B, S, H), dtype=jnp.float32)

    params = {
        "dense_w": jax.random.normal(k3, (H, H), dtype=jnp.float32) * 0.02,
        "dense_b": jax.random.normal(k4, (H,), dtype=jnp.float32) * 0.02,
        "ln_w": jnp.ones((H,), dtype=jnp.float32),
        "ln_b": jnp.zeros((H,), dtype=jnp.float32),
    }
    # One-time weight transpose + bf16 cast (done at parameter-init time).
    params = prepare_params(params, compute_dtype=jnp.bfloat16)

    out = bert_generation_self_output(hidden_states, input_tensor, params)
    out = jax.block_until_ready(out)

    ref = _reference(hidden_states, input_tensor, params)
    assert out.shape == (B, S, H)
    # bf16 matmul + f32 accumulation: tolerance loosened accordingly.
    assert jnp.allclose(out, ref, atol=2e-2, rtol=2e-2), (
        float(jnp.max(jnp.abs(out - ref))))
    print("KERNEL_OK")
</pallas_src>

<mosaic_0001>
module attributes {stable_mosaic.version = 11 : i64} {
  func.func @self_output_kernel(%arg0: i32, %arg1: memref<16x32xf32, #tpu.memory_space<vmem>>, %arg2: memref<16x32xf32, #tpu.memory_space<vmem>>, %arg3: memref<32x32xbf16, #tpu.memory_space<vmem>>, %arg4: memref<1x32xf32, #tpu.memory_space<vmem>>, %arg5: memref<1x32xf32, #tpu.memory_space<vmem>>, %arg6: memref<1x32xf32, #tpu.memory_space<vmem>>, %arg7: memref<16x32xf32, #tpu.memory_space<vmem>>) attributes {dimension_semantics = [#tpu.dimension_semantics<parallel>], iteration_bounds = array<i64: 1>, scalar_prefetch = 0 : i64, scratch_operands = 0 : i64, tpu.core_type = #tpu.core_type<tc>, window_params = [{transform_indices = @transform_0, window_bounds = array<i64: 16, 32>}, {transform_indices = @transform_1, window_bounds = array<i64: 16, 32>}, {pipeline_mode = #tpu.pipeline_mode<synchronous>, transform_indices = @transform_2, window_bounds = array<i64: 32, 32>}, {pipeline_mode = #tpu.pipeline_mode<synchronous>, transform_indices = @transform_3, window_bounds = array<i64: 1, 32>}, {pipeline_mode = #tpu.pipeline_mode<synchronous>, transform_indices = @transform_4, window_bounds = array<i64: 1, 32>}, {pipeline_mode = #tpu.pipeline_mode<synchronous>, transform_indices = @transform_5, window_bounds = array<i64: 1, 32>}, {transform_indices = @transform_6, window_bounds = array<i64: 16, 32>}]} {
    %c0 = arith.constant 0 : index
    %c0_0 = arith.constant 0 : index
    %0 = vector.load %arg1[%c0, %c0_0] : memref<16x32xf32, #tpu.memory_space<vmem>>, vector<16x32xf32>
    %1 = arith.truncf %0 : vector<16x32xf32> to vector<16x32xbf16>
    %c0_1 = arith.constant 0 : index
    %c0_2 = arith.constant 0 : index
    %2 = vector.load %arg3[%c0_1, %c0_2] : memref<32x32xbf16, #tpu.memory_space<vmem>>, vector<32x32xbf16>
    %cst = arith.constant dense<0.000000e+00> : vector<16x32xf32>
    %3 = tpu.matmul %1, %2, %cst {dimension_numbers = #tpu.dot_dimension_numbers<[1], [0], [0], [1], [0, 0, 1, 1], [], []>} : vector<16x32xbf16>, vector<32x32xbf16>, vector<16x32xf32> -> vector<16x32xf32>
    %c0_3 = arith.constant 0 : index
    %c0_4 = arith.constant 0 : index
    %4 = vector.load %arg4[%c0_3, %c0_4] : memref<1x32xf32, #tpu.memory_space<vmem>>, vector<1x32xf32>
    %5 = vector.broadcast %4 : vector<1x32xf32> to vector<16x32xf32>
    %6 = arith.addf %3, %5 : vector<16x32xf32>
    %c0_5 = arith.constant 0 : index
    %c0_6 = arith.constant 0 : index
    %7 = vector.load %arg2[%c0_5, %c0_6] : memref<16x32xf32, #tpu.memory_space<vmem>>, vector<16x32xf32>
    %8 = arith.addf %6, %7 : vector<16x32xf32>
    %cst_7 = arith.constant dense<0.000000e+00> : vector<16xf32>
    %9 = vector.multi_reduction <add>, %8, %cst_7 [1] : vector<16x32xf32> to vector<16xf32>
    %10 = vector.shape_cast %9 : vector<16xf32> to vector<16x1xf32>
    %11 = arith.mulf %8, %8 : vector<16x32xf32>
    %cst_8 = arith.constant dense<0.000000e+00> : vector<16xf32>
    %12 = vector.multi_reduction <add>, %11, %cst_8 [1] : vector<16x32xf32> to vector<16xf32>
    %13 = vector.shape_cast %12 : vector<16xf32> to vector<16x1xf32>
    %cst_9 = arith.constant 3.125000e-02 : f32
    %14 = vector.broadcast %cst_9 : f32 to vector<16x1xf32>
    %15 = arith.mulf %10, %14 : vector<16x1xf32>
    %cst_10 = arith.constant 3.125000e-02 : f32
    %16 = vector.broadcast %cst_10 : f32 to vector<16x1xf32>
    %17 = arith.mulf %13, %16 : vector<16x1xf32>
    %18 = arith.mulf %15, %15 : vector<16x1xf32>
    %19 = arith.subf %17, %18 : vector<16x1xf32>
    %cst_11 = arith.constant 0.000000e+00 : f32
    %20 = vector.broadcast %cst_11 : f32 to vector<16x1xf32>
    %21 = arith.maximumf %19, %20 : vector<16x1xf32>
    %cst_12 = arith.constant 9.99999996E-13 : f32
    %22 = vector.broadcast %cst_12 : f32 to vector<16x1xf32>
    %23 = arith.addf %21, %22 : vector<16x1xf32>
    %24 = math.rsqrt %23 : vector<16x1xf32>
    %25 = vector.broadcast %15 : vector<16x1xf32> to vector<16x32xf32>
    %26 = arith.subf %8, %25 : vector<16x32xf32>
    %27 = vector.broadcast %24 : vector<16x1xf32> to vector<16x32xf32>
    %28 = arith.mulf %26, %27 : vector<16x32xf32>
    %c0_13 = arith.constant 0 : index
    %c0_14 = arith.constant 0 : index
    %29 = vector.load %arg5[%c0_13, %c0_14] : memref<1x32xf32, #tpu.memory_space<vmem>>, vector<1x32xf32>
    %30 = vector.broadcast %29 : vector<1x32xf32> to vector<16x32xf32>
    %31 = arith.mulf %28, %30 : vector<16x32xf32>
    %c0_15 = arith.constant 0 : index
    %c0_16 = arith.constant 0 : index
    %32 = vector.load %arg6[%c0_15, %c0_16] : memref<1x32xf32, #tpu.memory_space<vmem>>, vector<1x32xf32>
    %33 = vector.broadcast %32 : vector<1x32xf32> to vector<16x32xf32>
    %34 = arith.addf %31, %33 : vector<16x32xf32>
    %c0_17 = arith.constant 0 : index
    %c0_18 = arith.constant 0 : index
    %35 = vector.load %arg7[%c0_17, %c0_18] : memref<16x32xf32, #tpu.memory_space<vmem>>, vector<16x32xf32>
    tpu.vector_store %arg7[%c0_17, %c0_18], %34 {strides = array<i32>} : memref<16x32xf32, #tpu.memory_space<vmem>>, vector<16x32xf32>,
    return
  }
  func.func @transform_0(%arg0: i32) -> (i32, i32) {
    %c0_i32 = arith.constant 0 : i32
    %c0_i32_0 = arith.constant 0 : i32
    return %arg0, %c0_i32 : i32, i32
  }
  func.func @transform_1(%arg0: i32) -> (i32, i32) {
    %c0_i32 = arith.constant 0 : i32
    %c0_i32_0 = arith.constant 0 : i32
    return %arg0, %c0_i32 : i32, i32
  }
  func.func @transform_2(%arg0: i32) -> (i32, i32) {
    %c0_i32 = arith.constant 0 : i32
    %c0_i32_0 = arith.constant 0 : i32
    %c0_i32_1 = arith.constant 0 : i32
    return %c0_i32, %c0_i32_0 : i32, i32
  }
  func.func @transform_3(%arg0: i32) -> (i32, i32) {
    %c0_i32 = arith.constant 0 : i32
    %c0_i32_0 = arith.constant 0 : i32
    %c0_i32_1 = arith.constant 0 : i32
    return %c0_i32, %c0_i32_0 : i32, i32
  }
  func.func @transform_4(%arg0: i32) -> (i32, i32) {
    %c0_i32 = arith.constant 0 : i32
    %c0_i32_0 = arith.constant 0 : i32
    %c0_i32_1 = arith.constant 0 : i32
    return %c0_i32, %c0_i32_0 : i32, i32
  }
  func.func @transform_5(%arg0: i32) -> (i32, i32) {
    %c0_i32 = arith.constant 0 : i32
    %c0_i32_0 = arith.constant 0 : i32
    %c0_i32_1 = arith.constant 0 : i32
    return %c0_i32, %c0_i32_0 : i32, i32
  }
  func.func @transform_6(%arg0: i32) -> (i32, i32) {
    %c0_i32 = arith.constant 0 : i32
    %c0_i32_0 = arith.constant 0 : i32
    return %arg0, %c0_i32 : i32, i32
  }
}

module attributes {stable_mosaic.version = 11 : i64} {
  func.func @self_output_kernel(%arg0: i32, %arg1: memref<16x32xf32, #tpu.memory_space<vmem>>, %arg2: memref<16x32xf32, #tpu.memory_space<vmem>>, %arg3: memref<32x32xbf16, #tpu.memory_space<vmem>>, %arg4: memref<1x32xf32, #tpu.memory_space<vmem>>, %arg5: memref<1x32xf32, #tpu.memory_space<vmem>>, %arg6: memref<1x32xf32, #tpu.memory_space<vmem>>, %arg7: memref<16x32xf32, #tpu.memory_space<vmem>>) attributes {dimension_semantics = [#tpu.dimension_semantics<parallel>], iteration_bounds = array<i64: 1>, scalar_prefetch = 0 : i64, scratch_operands = 0 : i64, tpu.core_type = #tpu.core_type<tc>, window_params = [{transform_indices = @transform_0, window_bounds = array<i64: 16, 32>}, {transform_indices = @transform_1, window_bounds = array<i64: 16, 32>}, {pipeline_mode = #tpu.pipeline_mode<synchronous>, transform_indices = @transform_2, window_bounds = array<i64: 32, 32>}, {pipeline_mode = #tpu.pipeline_mode<synchronous>, transform_indices = @transform_3, window_bounds = array<i64: 1, 32>}, {pipeline_mode = #tpu.pipeline_mode<synchronous>, transform_indices = @transform_4, window_bounds = array<i64: 1, 32>}, {pipeline_mode = #tpu.pipeline_mode<synchronous>, transform_indices = @transform_5, window_bounds = array<i64: 1, 32>}, {transform_indices = @transform_6, window_bounds = array<i64: 16, 32>}]} {
    %c0 = arith.constant 0 : index
    %c0_0 = arith.constant 0 : index
    %0 = vector.load %arg1[%c0, %c0_0] : memref<16x32xf32, #tpu.memory_space<vmem>>, vector<16x32xf32>
    %1 = arith.truncf %0 : vector<16x32xf32> to vector<16x32xbf16>
    %c0_1 = arith.constant 0 : index
    %c0_2 = arith.constant 0 : index
    %2 = vector.load %arg3[%c0_1, %c0_2] : memref<32x32xbf16, #tpu.memory_space<vmem>>, vector<32x32xbf16>
    %cst = arith.constant dense<0.000000e+00> : vector<16x32xf32>
    %3 = tpu.matmul %1, %2, %cst {dimension_numbers = #tpu.dot_dimension_numbers<[1], [0], [0], [1], [0, 0, 1, 1], [], []>} : vector<16x32xbf16>, vector<32x32xbf16>, vector<16x32xf32> -> vector<16x32xf32>
    %c0_3 = arith.constant 0 : index
    %c0_4 = arith.constant 0 : index
    %4 = vector.load %arg4[%c0_3, %c0_4] : memref<1x32xf32, #tpu.memory_space<vmem>>, vector<1x32xf32>
    %5 = vector.broadcast %4 : vector<1x32xf32> to vector<16x32xf32>
    %6 = arith.addf %3, %5 : vector<16x32xf32>
    %c0_5 = arith.constant 0 : index
    %c0_6 = arith.constant 0 : index
    %7 = vector.load %arg2[%c0_5, %c0_6] : memref<16x32xf32, #tpu.memory_space<vmem>>, vector<16x32xf32>
    %8 = arith.addf %6, %7 : vector<16x32xf32>
    %cst_7 = arith.constant dense<0.000000e+00> : vector<16xf32>
    %9 = vector.multi_reduction <add>, %8, %cst_7 [1] : vector<16x32xf32> to vector<16xf32>
    %10 = vector.shape_cast %9 : vector<16xf32> to vector<16x1xf32>
    %11 = arith.mulf %8, %8 : vector<16x32xf32>
    %cst_8 = arith.constant dense<0.000000e+00> : vector<16xf32>
    %12 = vector.multi_reduction <add>, %11, %cst_8 [1] : vector<16x32xf32> to vector<16xf32>
    %13 = vector.shape_cast %12 : vector<16xf32> to vector<16x1xf32>
    %cst_9 = arith.constant 3.125000e-02 : f32
    %14 = vector.broadcast %cst_9 : f32 to vector<16x1xf32>
    %15 = arith.mulf %10, %14 : vector<16x1xf32>
    %cst_10 = arith.constant 3.125000e-02 : f32
    %16 = vector.broadcast %cst_10 : f32 to vector<16x1xf32>
    %17 = arith.mulf %13, %16 : vector<16x1xf32>
    %18 = arith.mulf %15, %15 : vector<16x1xf32>
    %19 = arith.subf %17, %18 : vector<16x1xf32>
    %cst_11 = arith.constant 0.000000e+00 : f32
    %20 = vector.broadcast %cst_11 : f32 to vector<16x1xf32>
    %21 = arith.maximumf %19, %20 : vector<16x1xf32>
    %cst_12 = arith.constant 9.99999996E-13 : f32
    %22 = vector.broadcast %cst_12 : f32 to vector<16x1xf32>
    %23 = arith.addf %21, %22 : vector<16x1xf32>
    %24 = math.rsqrt %23 : vector<16x1xf32>
    %25 = vector.broadcast %15 : vector<16x1xf32> to vector<16x32xf32>
    %26 = arith.subf %8, %25 : vector<16x32xf32>
    %27 = vector.broadcast %24 : vector<16x1xf32> to vector<16x32xf32>
    %28 = arith.mulf %26, %27 : vector<16x32xf32>
    %c0_13 = arith.constant 0 : index
    %c0_14 = arith.constant 0 : index
    %29 = vector.load %arg5[%c0_13, %c0_14] : memref<1x32xf32, #tpu.memory_space<vmem>>, vector<1x32xf32>
    %30 = vector.broadcast %29 : vector<1x32xf32> to vector<16x32xf32>
    %31 = arith.mulf %28, %30 : vector<16x32xf32>
    %c0_15 = arith.constant 0 : index
    %c0_16 = arith.constant 0 : index
    %32 = vector.load %arg6[%c0_15, %c0_16] : memref<1x32xf32, #tpu.memory_space<vmem>>, vector<1x32xf32>
    %33 = vector.broadcast %32 : vector<1x32xf32> to vector<16x32xf32>
    %34 = arith.addf %31, %33 : vector<16x32xf32>
    %c0_17 = arith.constant 0 : index
    %c0_18 = arith.constant 0 : index
    %35 = vector.load %arg7[%c0_17, %c0_18] : memref<16x32xf32, #tpu.memory_space<vmem>>, vector<16x32xf32>
    tpu.vector_store %arg7[%c0_17, %c0_18], %34 {strides = array<i32>} : memref<16x32xf32, #tpu.memory_space<vmem>>, vector<16x32xf32>,
    return
  }
  func.func @transform_0(%arg0: i32) -> (i32, i32) {
    %c0_i32 = arith.constant 0 : i32
    %c0_i32_0 = arith.constant 0 : i32
    return %arg0, %c0_i32 : i32, i32
  }
  func.func @transform_1(%arg0: i32) -> (i32, i32) {
    %c0_i32 = arith.constant 0 : i32
    %c0_i32_0 = arith.constant 0 : i32
    return %arg0, %c0_i32 : i32, i32
  }
  func.func @transform_2(%arg0: i32) -> (i32, i32) {
    %c0_i32 = arith.constant 0 : i32
    %c0_i32_0 = arith.constant 0 : i32
    %c0_i32_1 = arith.constant 0 : i32
    return %c0_i32, %c0_i32_0 : i32, i32
  }
  func.func @transform_3(%arg0: i32) -> (i32, i32) {
    %c0_i32 = arith.constant 0 : i32
    %c0_i32_0 = arith.constant 0 : i32
    %c0_i32_1 = arith.constant 0 : i32
    return %c0_i32, %c0_i32_0 : i32, i32
  }
  func.func @transform_4(%arg0: i32) -> (i32, i32) {
    %c0_i32 = arith.constant 0 : i32
    %c0_i32_0 = arith.constant 0 : i32
    %c0_i32_1 = arith.constant 0 : i32
    return %c0_i32, %c0_i32_0 : i32, i32
  }
  func.func @transform_5(%arg0: i32) -> (i32, i32) {
    %c0_i32 = arith.constant 0 : i32
    %c0_i32_0 = arith.constant 0 : i32
    %c0_i32_1 = arith.constant 0 : i32
    return %c0_i32, %c0_i32_0 : i32, i32
  }
  func.func @transform_6(%arg0: i32) -> (i32, i32) {
    %c0_i32 = arith.constant 0 : i32
    %c0_i32_0 = arith.constant 0 : i32
    return %arg0, %c0_i32 : i32, i32
  }
}

</mosaic_0001>

<bundles_post_ra>
// kernel: tpu_custom_call.1
= control target key start
LH: loop header
LB: loop body
LE: loop exit
PB: predicated region body
PF: predicated region fallthrough
CT: control target
= control target key end

     0   :  { %11 = vsyncpa [#allocation3], 0  ;;  %s463_s0 = inlined_call_operand.hbm [shape: f32[16,32], index: 0, kind: input, shape index: {}]   ;;  %s464_s1 = inlined_call_operand.hbm [shape: f32[16,32], index: 1, kind: input, shape index: {}]   ;;  %s465_s2 = inlined_call_operand.hbm [shape: bf16[32,32], index: 2, kind: input, shape index: {}]   ;;  %s466_s3 = inlined_call_operand.vmem [shape: f32[1,32], index: 3, kind: input, shape index: {}]   ;;  %s467_s4 = inlined_call_operand.vmem [shape: f32[1,32], index: 4, kind: input, shape index: {}]   ;;  %s468_s5 = inlined_call_operand.vmem [shape: f32[1,32], index: 5, kind: input, shape index: {}]   ;;  %s469_s6 = inlined_call_operand.hbm [shape: f32[16,32], index: 6, kind: output, shape index: {}]  }
   0x1   :  { %12 = vsyncpa [#allocation6], 0 }
   0x2   :  { %13 = vsyncpa [#allocation4], 0  ;;  %s338_s21 = smov [#allocation5]   ;;  %s339_s23 = smov [#allocation2]  }
   0x3   :  { %s31_s22 = sshll.u32 %s338_s21, 4  ;;  %s19_s24 = sshll.u32 %s339_s23, 4  ;;  %s32_s22 = int_to_ptr.vmem [resolvable:$true] %s31_s22  ;;  %s383_s24 = int_to_ptr.vmem [resolvable:$true] %s19_s24 }
   0x4   :  { %s244_s27 = scalar_lea.hbm %s464_s1, 256 }
   0x5   :  { %p245_p0 = scmp.ne.s32.totalorder %s464_s1, %s244_s27  ;;  %p248_p1 = scmp.lt.u32.totalorder %s244_s27, %s464_s1 }
   0x7   :  { %p250_p2 = pnand %p248_p1, %p245_p0 }
   0x9   :  { %253 = shalt.err (!%p250_p2)
}
   0xa   :  { %s254_s8 = scalar_lea.vmem %s32_s22, 256  ;;  %p259_p4 = scmp.lt.s32.totalorder %s32_s22, %s32_s22 }
   0xb   :  { %p255_p3 = scmp.ne.s32.totalorder %s32_s22, %s254_s8  ;;  %p260_p5 = scmp.lt.s32.totalorder %s254_s8, %s254_s8 }
   0xd   :  { %p261_p6 = por %p260_p5, %p259_p4 }
   0xf   :  { %p262_p7 = pnand %p261_p6, %p255_p3 }
  0x11   :  { %265 = shalt.err (!%p262_p7)
}
  0x12   :  { %s340_s9 = smov 128   ;;  %s341_s10 = smov 8  }
  0x13   :  { %37 = dma.hbm_to_vmem [thread:$0]  %s464_s1, 256, %s32_s22, [#allocation6], %s340_s9, %s340_s9, %s341_s10  }
  0x14   :  { %s266_s15 = scalar_lea.hbm %s463_s0, 256 }
  0x15   :  { %p267_p8 = scmp.ne.s32.totalorder %s463_s0, %s266_s15  ;;  %p270_p9 = scmp.lt.u32.totalorder %s266_s15, %s463_s0 }
  0x17   :  { %p272_p10 = pnand %p270_p9, %p267_p8 }
  0x19   :  { %275 = shalt.err (!%p272_p10)
}
  0x1a   :  { %s276_s20 = scalar_lea.vmem %s383_s24, 256  ;;  %p281_p12 = scmp.lt.s32.totalorder %s383_s24, %s383_s24 }
  0x1b   :  { %p277_p11 = scmp.ne.s32.totalorder %s383_s24, %s276_s20  ;;  %p282_p13 = scmp.lt.s32.totalorder %s276_s20, %s276_s20 }
  0x1d   :  { %p283_p0 = por %p282_p13, %p281_p12 }
  0x1f   :  { %p284_p1 = pnand %p283_p0, %p277_p11 }
  0x21   :  { %287 = shalt.err (!%p284_p1)
}
  0x22   :  { %25 = dma.hbm_to_vmem [thread:$0]  %s463_s0, 256, %s383_s24, [#allocation3], %s340_s9, %s340_s9, %s341_s10  }
  0x23   :  { %s342_s22 = smov [#allocation7]   ;;  %s288_s27 = scalar_lea.hbm %s465_s2, 256 }
  0x24   :  { %s43_s23 = sshll.u32 %s342_s22, 4  ;;  %p289_p2 = scmp.ne.s32.totalorder %s465_s2, %s288_s27  ;;  %s44_s23 = int_to_ptr.vmem [resolvable:$true] %s43_s23 }
  0x25   :  { %p292_p3 = scmp.lt.u32.totalorder %s288_s27, %s465_s2 }
  0x27   :  { %p294_p4 = pnand %p292_p3, %p289_p2 }
  0x29   :  { %297 = shalt.err (!%p294_p4)
}
  0x2a   :  { %s298_s8 = scalar_lea.vmem %s44_s23, 256  ;;  %p303_p6 = scmp.lt.s32.totalorder %s44_s23, %s44_s23 }
  0x2b   :  { %p299_p5 = scmp.ne.s32.totalorder %s44_s23, %s298_s8  ;;  %p304_p7 = scmp.lt.s32.totalorder %s298_s8, %s298_s8 }
  0x2d   :  { %p305_p8 = por %p304_p7, %p303_p6 }
  0x2f   :  { %p306_p9 = pnand %p305_p8, %p299_p5 }
  0x31   :  { %309 = shalt.err (!%p306_p9)
}
  0x32   :  { %s343_s0 = smov 64   ;;  %s344_s24 = smov 4  }
  0x33   :  { %49 = dma.hbm_to_vmem [thread:$0]  %s465_s2, 256, %s44_s23, [#allocation6], %s343_s0, %s343_s0, %s344_s24  }
  0x34   :  { %332 = dma.done.wait [#allocation3], 256  }
  0x35   :  { %333 = vsyncadd [#allocation3], 4294967040 }
  0x36   :  { %334 = dma.done.wait [#allocation6], 512  }
  0x37   :  { %335 = vsyncadd [#allocation6], 4294966784  ;;  %v345_v0 = vmov 0.0   ;;  %vm346_vm0 = vmmov 0   ;;  %v238_v1 = vld [vmem:[#allocation7] sm:$0xff]   ;;  %v239_v2 = vld [vmem:[#allocation7 + $0x8] sm:$0xff]  }
  0x38   :  { %220 = vmatprep.subr.bf16.mxu0 %v345_v0  ;;  %224 = vmatprep.mubr.msk.bf16.mxu0 %vm346_vm0, %v345_v0  ;;  %v66_v3 = vld [vmem:[#allocation2] sm:$0xff]  ;;  %v67_v4 = vld [vmem:[#allocation2 + $0x8] sm:$0xff]  ;;  %vm92_vm1 = vcmask 261120   ;;  %v137_v8 = vld [vmem:[#allocation5] sm:$0xff]  ;;  %s347_s17 = smov [#allocation8]  }
  0x39   :  { %221 = vmatpush3.bf16.msra.mxu0 %v238_v1  ;;  %v68_v5 = vpack.c.bf16 %v67_v4, %v66_v3  ;;  %v211_v6 = vld [vmem:[%s466_s3] ss:$0 sm:$0xff]  ;;  %v138_v12 = vld [vmem:[#allocation5 + $0x8] sm:$0xff]  ;;  %s198_s18 = sshll.u32 %s347_s17, 4  ;;  %s199_s18 = int_to_ptr.vmem [resolvable:$true] %s198_s18 }
  0x3a   :  { %222 = vmatprep.subr.bf16.mxu0 %v345_v0  ;;  %v215_v41 = vld [vmem:[%s467_s4] ss:$0 sm:$0xff]  ;;  %s310_s4 = scalar_lea.vmem %s199_s18, 256  ;;  %p315_p11 = scmp.lt.s32.totalorder %s199_s18, %s199_s18 }
  0x3b   :  { %v216_v43 = vld [vmem:[%s468_s5] ss:$0 sm:$0xff]  ;;  %p311_p10 = scmp.ne.s32.totalorder %s199_s18, %s310_s4  ;;  %p316_p12 = scmp.lt.s32.totalorder %s310_s4, %s310_s4 }
  0x3d   :  { %223 = vmatpush3.bf16.msra.mxu0 %v239_v2  ;;  %p317_p13 = por %p316_p12, %p315_p11 }
  0x3f   :  { %p318_p0 = pnand %p317_p13, %p311_p10 }
  0x40   :  { %225 = vmatmul.mubr.msk.bf16.vlgmr.msra.gmra.mrb[0].mxu0 %vm92_vm1, %v68_v5 }
 0x113   :  { %v130_v7 = vpop.f32.mrb[0].mxu0 }
 0x114   :  { %v131_v9 = vadd.f32 %v211_v6, %v130_v7  ;;  %v226_v10 = vpop.f32.mrb[1].mxu0 }
 0x115   :  { %v133_v11 = vpop.f32.mrb[2].mxu0 }
 0x116   :  { %v139_v13 = vadd.f32 %v137_v8, %v131_v9  ;;  %v134_v14 = vadd.f32 %v211_v6, %v133_v11  ;;  %v227_v15 = vpop.f32.mrb[3].mxu0 }
 0x118   :  { %v140_v16 = vadd.f32 %v138_v12, %v134_v14  ;;  %v141_v17 = vsel %vm92_vm1, %v139_v13, 0.0  ;;  %v147_v18 = vmul.f32 %v139_v13, %v139_v13 }
 0x119   :  { %142 = vadd.xlane.f32.xlu0 %v141_v17 }
 0x11a   :  { %v149_v19 = vsel %vm92_vm1, %v147_v18, 0.0  ;;  %v148_v20 = vmul.f32 %v140_v16, %v140_v16  ;;  %v144_v21 = vsel %vm92_vm1, %v140_v16, 0.0 }
 0x11b   :  { %150 = vadd.xlane.f32.xlu1 %v149_v19 }
 0x11c   :  { %v152_v22 = vsel %vm92_vm1, %v148_v20, 0.0 }
 0x11d   :  { %145 = vadd.xlane.f32.xlu0 %v144_v21 }
 0x11f   :  { %153 = vadd.xlane.f32.xlu1 %v152_v22 }
 0x1a6   :  { %v143_v23 = vpop.xlane.xlu0 %142 }
 0x1a7   :  { %v155_v24 = vmul.f32 0.03125, %v143_v23 }
 0x1a8   :  { %v151_v25 = vpop.xlane.xlu1 %150 }
 0x1a9   :  { %v159_v26 = vmul.f32 %v155_v24, %v155_v24  ;;  %v157_v27 = vmul.f32 0.03125, %v151_v25  ;;  %v169_v39 = vsub.f32 %v139_v13, %v155_v24 }
 0x1aa   :  { %v146_v28 = vpop.xlane.xlu0 %145 }
 0x1ab   :  { %v161_v29 = vsub.f32 %v157_v27, %v159_v26  ;;  %v156_v30 = vmul.f32 0.03125, %v146_v28 }
 0x1ac   :  { %v154_v31 = vpop.xlane.xlu1 %153 }
 0x1ad   :  { %v163_v32 = vmax.f32 %v161_v29, 0.0  ;;  %v160_v33 = vmul.f32 %v156_v30, %v156_v30  ;;  %v158_v34 = vmul.f32 0.03125, %v154_v31  ;;  %v170_v44 = vsub.f32 %v140_v16, %v156_v30 }
 0x1af   :  { %v165_v35 = vadd.f32 1e-12, %v163_v32  ;;  %v162_v36 = vsub.f32 %v158_v34, %v160_v33 }
 0x1b1   :  { %240 = vrsqrt.f32 %v165_v35  ;;  %v164_v37 = vmax.f32 %v162_v36, 0.0 }
 0x1b3   :  { %v166_v38 = vadd.f32 1e-12, %v164_v37 }
 0x1b5   :  { %242 = vrsqrt.f32 %v166_v38 }
 0x1bb   :  { %v241_v40 = vpop.eup %240 }
 0x1bc   :  { %v171_v42 = vmul.f32 %v241_v40, %v169_v39 }
 0x1be   :  { %v180_v45 = vmul.f32 %v215_v41, %v171_v42 }
 0x1bf   :  { %v243_v46 = vpop.eup %242 }
 0x1c0   :  { %v172_v47 = vmul.f32 %v243_v46, %v170_v44  ;;  %v189_v48 = vadd.f32 %v216_v43, %v180_v45 }
 0x1c2   :  { %v181_v49 = vmul.f32 %v215_v41, %v172_v47  ;;  %191 = vst.msk [vmem:[#allocation8] sm:$0xff] %vm92_vm1, %v189_v48 }
 0x1c4   :  { %v190_v50 = vadd.f32 %v216_v43, %v181_v49 }
 0x1c6   :  { %192 = vst.msk [vmem:[#allocation8 + $0x8] sm:$0xff] %vm92_vm1, %v190_v50 }
 0x1c7   :  { %321 = shalt.err (!%p318_p0)
}
 0x1c8   :  { %s322_s20 = scalar_lea.hbm %s469_s6, 256 }
 0x1c9   :  { %p323_p1 = scmp.ne.s32.totalorder %s469_s6, %s322_s20  ;;  %p326_p2 = scmp.lt.u32.totalorder %s322_s20, %s469_s6 }
 0x1cb   :  { %p328_p3 = pnand %p326_p2, %p323_p1 }
 0x1cd   :  { %331 = shalt.err (!%p328_p3)
}
 0x1ce   :  { %204 = dma.vmem_to_hbm [thread:$0]  %s199_s18, 256, %s469_s6, [#allocation4], %s340_s9, %s340_s9, %s341_s10  }
 0x1cf   :  { %336 = dma.done.wait [#allocation4], 256  }
 0x1d0   :  { %337 = vsyncadd [#allocation4], 4294967040 }
 0x1d1   :  { %208 = vsyncpa [#allocation3], 1 }
 0x1d2   :  { %209 = vsyncpa [#allocation6], 1 }
 0x1d3   :  { %210 = vsyncpa [#allocation4], 1 }

// kernel: tpu_custom_call.1
= control target key start
LH: loop header
LB: loop body
LE: loop exit
PB: predicated region body
PF: predicated region fallthrough
CT: control target
= control target key end

     0   :  { %11 = vsyncpa [#allocation3], 0  ;;  %s463_s0 = inlined_call_operand.hbm [shape: f32[16,32], index: 0, kind: input, shape index: {}]   ;;  %s464_s1 = inlined_call_operand.hbm [shape: f32[16,32], index: 1, kind: input, shape index: {}]   ;;  %s465_s2 = inlined_call_operand.hbm [shape: bf16[32,32], index: 2, kind: input, shape index: {}]   ;;  %s466_s3 = inlined_call_operand.vmem [shape: f32[1,32], index: 3, kind: input, shape index: {}]   ;;  %s467_s4 = inlined_call_operand.vmem [shape: f32[1,32], index: 4, kind: input, shape index: {}]   ;;  %s468_s5 = inlined_call_operand.vmem [shape: f32[1,32], index: 5, kind: input, shape index: {}]   ;;  %s469_s6 = inlined_call_operand.hbm [shape: f32[16,32], index: 6, kind: output, shape index: {}]  }
   0x1   :  { %12 = vsyncpa [#allocation6], 0 }
   0x2   :  { %13 = vsyncpa [#allocation4], 0  ;;  %s338_s21 = smov [#allocation5]   ;;  %s339_s23 = smov [#allocation2]  }
   0x3   :  { %s31_s22 = sshll.u32 %s338_s21, 4  ;;  %s19_s24 = sshll.u32 %s339_s23, 4  ;;  %s32_s22 = int_to_ptr.vmem [resolvable:$true] %s31_s22  ;;  %s383_s24 = int_to_ptr.vmem [resolvable:$true] %s19_s24 }
   0x4   :  { %s244_s27 = scalar_lea.hbm %s464_s1, 256 }
   0x5   :  { %p245_p0 = scmp.ne.s32.totalorder %s464_s1, %s244_s27  ;;  %p248_p1 = scmp.lt.u32.totalorder %s244_s27, %s464_s1 }
   0x7   :  { %p250_p2 = pnand %p248_p1, %p245_p0 }
   0x9   :  { %253 = shalt.err (!%p250_p2)
}
   0xa   :  { %s254_s8 = scalar_lea.vmem %s32_s22, 256  ;;  %p259_p4 = scmp.lt.s32.totalorder %s32_s22, %s32_s22 }
   0xb   :  { %p255_p3 = scmp.ne.s32.totalorder %s32_s22, %s254_s8  ;;  %p260_p5 = scmp.lt.s32.totalorder %s254_s8, %s254_s8 }
   0xd   :  { %p261_p6 = por %p260_p5, %p259_p4 }
   0xf   :  { %p262_p7 = pnand %p261_p6, %p255_p3 }
  0x11   :  { %265 = shalt.err (!%p262_p7)
}
  0x12   :  { %s340_s9 = smov 128   ;;  %s341_s10 = smov 8  }
  0x13   :  { %37 = dma.hbm_to_vmem [thread:$0]  %s464_s1, 256, %s32_s22, [#allocation6], %s340_s9, %s340_s9, %s341_s10  }
  0x14   :  { %s266_s15 = scalar_lea.hbm %s463_s0, 256 }
  0x15   :  { %p267_p8 = scmp.ne.s32.totalorder %s463_s0, %s266_s15  ;;  %p270_p9 = scmp.lt.u32.totalorder %s266_s15, %s463_s0 }
  0x17   :  { %p272_p10 = pnand %p270_p9, %p267_p8 }
  0x19   :  { %275 = shalt.err (!%p272_p10)
}
  0x1a   :  { %s276_s20 = scalar_lea.vmem %s383_s24, 256  ;;  %p281_p12 = scmp.lt.s32.totalorder %s383_s24, %s383_s24 }
  0x1b   :  { %p277_p11 = scmp.ne.s32.totalorder %s383_s24, %s276_s20  ;;  %p282_p13 = scmp.lt.s32.totalorder %s276_s20, %s276_s20 }
  0x1d   :  { %p283_p0 = por %p282_p13, %p281_p12 }
  0x1f   :  { %p284_p1 = pnand %p283_p0, %p277_p11 }
  0x21   :  { %287 = shalt.err (!%p284_p1)
}
  0x22   :  { %25 = dma.hbm_to_vmem [thread:$0]  %s463_s0, 256, %s383_s24, [#allocation3], %s340_s9, %s340_s9, %s341_s10  }
  0x23   :  { %s342_s22 = smov [#allocation7]   ;;  %s288_s27 = scalar_lea.hbm %s465_s2, 256 }
  0x24   :  { %s43_s23 = sshll.u32 %s342_s22, 4  ;;  %p289_p2 = scmp.ne.s32.totalorder %s465_s2, %s288_s27  ;;  %s44_s23 = int_to_ptr.vmem [resolvable:$true] %s43_s23 }
  0x25   :  { %p292_p3 = scmp.lt.u32.totalorder %s288_s27, %s465_s2 }
  0x27   :  { %p294_p4 = pnand %p292_p3, %p289_p2 }
  0x29   :  { %297 = shalt.err (!%p294_p4)
}
  0x2a   :  { %s298_s8 = scalar_lea.vmem %s44_s23, 256  ;;  %p303_p6 = scmp.lt.s32.totalorder %s44_s23, %s44_s23 }
  0x2b   :  { %p299_p5 = scmp.ne.s32.totalorder %s44_s23, %s298_s8  ;;  %p304_p7 = scmp.lt.s32.totalorder %s298_s8, %s298_s8 }
  0x2d   :  { %p305_p8 = por %p304_p7, %p303_p6 }
  0x2f   :  { %p306_p9 = pnand %p305_p8, %p299_p5 }
  0x31   :  { %309 = shalt.err (!%p306_p9)
}
  0x32   :  { %s343_s0 = smov 64   ;;  %s344_s24 = smov 4  }
  0x33   :  { %49 = dma.hbm_to_vmem [thread:$0]  %s465_s2, 256, %s44_s23, [#allocation6], %s343_s0, %s343_s0, %s344_s24  }
  0x34   :  { %332 = dma.done.wait [#allocation3], 256  }
  0x35   :  { %333 = vsyncadd [#allocation3], 4294967040 }
  0x36   :  { %334 = dma.done.wait [#allocation6], 512  }
  0x37   :  { %335 = vsyncadd [#allocation6], 4294966784  ;;  %v345_v0 = vmov 0.0   ;;  %vm346_vm0 = vmmov 0   ;;  %v238_v1 = vld [vmem:[#allocation7] sm:$0xff]   ;;  %v239_v2 = vld [vmem:[#allocation7 + $0x8] sm:$0xff]  }
  0x38   :  { %220 = vmatprep.subr.bf16.mxu0 %v345_v0  ;;  %224 = vmatprep.mubr.msk.bf16.mxu0 %vm346_vm0, %v345_v0  ;;  %v66_v3 = vld [vmem:[#allocation2] sm:$0xff]  ;;  %v67_v4 = vld [vmem:[#allocation2 + $0x8] sm:$0xff]  ;;  %vm92_vm1 = vcmask 261120   ;;  %v137_v8 = vld [vmem:[#allocation5] sm:$0xff]  ;;  %s347_s17 = smov [#allocation8]  }
  0x39   :  { %221 = vmatpush3.bf16.msra.mxu0 %v238_v1  ;;  %v68_v5 = vpack.c.bf16 %v67_v4, %v66_v3  ;;  %v211_v6 = vld [vmem:[%s466_s3] ss:$0 sm:$0xff]  ;;  %v138_v12 = vld [vmem:[#allocation5 + $0x8] sm:$0xff]  ;;  %s198_s18 = sshll.u32 %s347_s17, 4  ;;  %s199_s18 = int_to_ptr.vmem [resolvable:$true] %s198_s18 }
  0x3a   :  { %222 = vmatprep.subr.bf16.mxu0 %v345_v0  ;;  %v215_v41 = vld [vmem:[%s467_s4] ss:$0 sm:$0xff]  ;;  %s310_s4 = scalar_lea.vmem %s199_s18, 256  ;;  %p315_p11 = scmp.lt.s32.totalorder %s199_s18, %s199_s18 }
  0x3b   :  { %v216_v43 = vld [vmem:[%s468_s5] ss:$0 sm:$0xff]  ;;  %p311_p10 = scmp.ne.s32.totalorder %s199_s18, %s310_s4  ;;  %p316_p12 = scmp.lt.s32.totalorder %s310_s4, %s310_s4 }
  0x3d   :  { %223 = vmatpush3.bf16.msra.mxu0 %v239_v2  ;;  %p317_p13 = por %p316_p12, %p315_p11 }
  0x3f   :  { %p318_p0 = pnand %p317_p13, %p311_p10 }
  0x40   :  { %225 = vmatmul.mubr.msk.bf16.vlgmr.msra.gmra.mrb[0].mxu0 %vm92_vm1, %v68_v5 }
 0x113   :  { %v130_v7 = vpop.f32.mrb[0].mxu0 }
 0x114   :  { %v131_v9 = vadd.f32 %v211_v6, %v130_v7  ;;  %v226_v10 = vpop.f32.mrb[1].mxu0 }
 0x115   :  { %v133_v11 = vpop.f32.mrb[2].mxu0 }
 0x116   :  { %v139_v13 = vadd.f32 %v137_v8, %v131_v9  ;;  %v134_v14 = vadd.f32 %v211_v6, %v133_v11  ;;  %v227_v15 = vpop.f32.mrb[3].mxu0 }
 0x118   :  { %v140_v16 = vadd.f32 %v138_v12, %v134_v14  ;;  %v141_v17 = vsel %vm92_vm1, %v139_v13, 0.0  ;;  %v147_v18 = vmul.f32 %v139_v13, %v139_v13 }
 0x119   :  { %142 = vadd.xlane.f32.xlu0 %v141_v17 }
 0x11a   :  { %v149_v19 = vsel %vm92_vm1, %v147_v18, 0.0  ;;  %v148_v20 = vmul.f32 %v140_v16, %v140_v16  ;;  %v144_v21 = vsel %vm92_vm1, %v140_v16, 0.0 }
 0x11b   :  { %150 = vadd.xlane.f32.xlu1 %v149_v19 }
 0x11c   :  { %v152_v22 = vsel %vm92_vm1, %v148_v20, 0.0 }
 0x11d   :  { %145 = vadd.xlane.f32.xlu0 %v144_v21 }
 0x11f   :  { %153 = vadd.xlane.f32.xlu1 %v152_v22 }
 0x1a6   :  { %v143_v23 = vpop.xlane.xlu0 %142 }
 0x1a7   :  { %v155_v24 = vmul.f32 0.03125, %v143_v23 }
 0x1a8   :  { %v151_v25 = vpop.xlane.xlu1 %150 }
 0x1a9   :  { %v159_v26 = vmul.f32 %v155_v24, %v155_v24  ;;  %v157_v27 = vmul.f32 0.03125, %v151_v25  ;;  %v169_v39 = vsub.f32 %v139_v13, %v155_v24 }
 0x1aa   :  { %v146_v28 = vpop.xlane.xlu0 %145 }
 0x1ab   :  { %v161_v29 = vsub.f32 %v157_v27, %v159_v26  ;;  %v156_v30 = vmul.f32 0.03125, %v146_v28 }
 0x1ac   :  { %v154_v31 = vpop.xlane.xlu1 %153 }
 0x1ad   :  { %v163_v32 = vmax.f32 %v161_v29, 0.0  ;;  %v160_v33 = vmul.f32 %v156_v30, %v156_v30  ;;  %v158_v34 = vmul.f32 0.03125, %v154_v31  ;;  %v170_v44 = vsub.f32 %v140_v16, %v156_v30 }
 0x1af   :  { %v165_v35 = vadd.f32 1e-12, %v163_v32  ;;  %v162_v36 = vsub.f32 %v158_v34, %v160_v33 }
 0x1b1   :  { %240 = vrsqrt.f32 %v165_v35  ;;  %v164_v37 = vmax.f32 %v162_v36, 0.0 }
 0x1b3   :  { %v166_v38 = vadd.f32 1e-12, %v164_v37 }
 0x1b5   :  { %242 = vrsqrt.f32 %v166_v38 }
 0x1bb   :  { %v241_v40 = vpop.eup %240 }
 0x1bc   :  { %v171_v42 = vmul.f32 %v241_v40, %v169_v39 }
 0x1be   :  { %v180_v45 = vmul.f32 %v215_v41, %v171_v42 }
 0x1bf   :  { %v243_v46 = vpop.eup %242 }
 0x1c0   :  { %v172_v47 = vmul.f32 %v243_v46, %v170_v44  ;;  %v189_v48 = vadd.f32 %v216_v43, %v180_v45 }
 0x1c2   :  { %v181_v49 = vmul.f32 %v215_v41, %v172_v47  ;;  %191 = vst.msk [vmem:[#allocation8] sm:$0xff] %vm92_vm1, %v189_v48 }
 0x1c4   :  { %v190_v50 = vadd.f32 %v216_v43, %v181_v49 }
 0x1c6   :  { %192 = vst.msk [vmem:[#allocation8 + $0x8] sm:$0xff] %vm92_vm1, %v190_v50 }
 0x1c7   :  { %321 = shalt.err (!%p318_p0)
}
 0x1c8   :  { %s322_s20 = scalar_lea.hbm %s469_s6, 256 }
 0x1c9   :  { %p323_p1 = scmp.ne.s32.totalorder %s469_s6, %s322_s20  ;;  %p326_p2 = scmp.lt.u32.totalorder %s322_s20, %s469_s6 }
 0x1cb   :  { %p328_p3 = pnand %p326_p2, %p323_p1 }
 0x1cd   :  { %331 = shalt.err (!%p328_p3)
}
 0x1ce   :  { %204 = dma.vmem_to_hbm [thread:$0]  %s199_s18, 256, %s469_s6, [#allocation4], %s340_s9, %s340_s9, %s341_s10  }
 0x1cf   :  { %336 = dma.done.wait [#allocation4], 256  }
 0x1d0   :  { %337 = vsyncadd [#allocation4], 4294967040 }
 0x1d1   :  { %208 = vsyncpa [#allocation3], 1 }
 0x1d2   :  { %209 = vsyncpa [#allocation6], 1 }
 0x1d3   :  { %210 = vsyncpa [#allocation4], 1 }

</bundles_post_ra>
